<compile_context>
chip_gen: v6e
topology: v6e:2x2x1
jax: 0.10.0
libtpu: 0.0.40
codegen_flags: <defaults>
</compile_context>

<pallas_src>
import numpy as np
import jax
import jax.numpy as jnp
from jax.experimental import pallas as pl
from jax.experimental.pallas import tpu as pltpu


def _add_pe_kernel(x_ref, pe_ref, o_ref):
    # x_ref : (Bb, S, D) VMEM tile of the input
    # pe_ref: (Bb, 1, D) VMEM tile -- one pe row per batch row in this block
    # Pure VPU add; pe broadcasts over the seq (sublane) axis for free.
    o_ref[...] = x_ref[...] + pe_ref[...]


def make_pe_buffer(d_model: int, max_len: int = 5000) -> jnp.ndarray:
    """Deterministic buffer, identical to the torch __init__ construction."""
    pe = np.zeros((max_len, d_model), dtype=np.float32)
    position = np.arange(0, max_len, dtype=np.float32)[:, None]
    div_term = np.exp(
        np.arange(0, d_model, 2, dtype=np.float32) * (-np.log(10000.0) / d_model)
    )
    pe[:, 0::2] = np.sin(position * div_term)
    pe[:, 1::2] = np.cos(position * div_term)
    # torch: pe.unsqueeze(0).transpose(0, 1) -> (max_len, 1, d_model)
    return jnp.asarray(pe[:, None, :])


def _pick_batch_block(B: int, S: int, D: int, itemsize: int,
                      target_bytes: int = 2 << 20) -> int:
    """Largest batch-block with Bb*S*D*itemsize <= ~2 MiB, keeping >=2 grid steps
    (when B >= 2) so a 'parallel' batch axis can shard across v7x's 2 TCs."""
    row_bytes = max(S * D * itemsize, 1)
    bb = max(1, min(B, target_bytes // row_bytes))
    if B >= 2:
        bb = min(bb, -(-B // 2))  # ceil(B/2) -> at least 2 grid steps
    return int(bb)


def positional_encoding_forward(x: jnp.ndarray, pe: jnp.ndarray) -> jnp.ndarray:
    """x: (B, S, D).  pe: (max_len, 1, D).  Returns x + pe[:S] (eval-mode forward)."""
    B, S, D = x.shape
    if B != S:
        # Literal torch broadcast of (B,S,D) + (S,1,D) requires batch == seq_len.
        raise ValueError("literal torch broadcast of this module requires batch == seq_len")

    pe_slice = pe[:S].astype(x.dtype)  # (S, 1, D), matches torch's pe[:x.size(1), :]

    itemsize = jnp.dtype(x.dtype).itemsize
    bb = _pick_batch_block(B, S, D, itemsize)
    nb = pl.cdiv(B, bb)

    # Double-buffered x-in + out + pe-in footprint, with headroom; cap at 32 MiB
    # (<= scoped default on v6e/v7x, and safely raisable on v5e's 128 MiB VMEM).
    x_blk_bytes = bb * S * D * itemsize
    pe_blk_bytes = bb * 1 * D * itemsize
    vmem_need = 2 * (2 * x_blk_bytes + pe_blk_bytes)
    vmem_limit = int(min(max(2 * vmem_need, 16 * 1024 * 1024), 32 * 1024 * 1024))

    cost = pl.CostEstimate(
        flops=B * S * D,
        transcendentals=0,
        bytes_accessed=2 * B * S * D * itemsize + S * D * itemsize,
    )

    out = pl.pallas_call(
        _add_pe_kernel,
        out_shape=jax.ShapeDtypeStruct((B, S, D), x.dtype),
        grid_spec=pltpu.PrefetchScalarGridSpec(
            num_scalar_prefetch=0,
            grid=(nb,),
            in_specs=[
                pl.BlockSpec((bb, S, D), lambda i: (i, 0, 0)),   # x: Bb batch rows
                pl.BlockSpec((bb, 1, D), lambda i: (i, 0, 0)),   # pe rows for those batches
            ],
            out_specs=pl.BlockSpec((bb, S, D), lambda i: (i, 0, 0)),
        ),
        compiler_params=pltpu.CompilerParams(
            dimension_semantics=("parallel",),
            vmem_limit_bytes=vmem_limit,
        ),
        cost_estimate=cost,
        # NOTE: input_output_aliases={0: 0} would save an output allocation, but
        # only pays off when the caller donates x; left off to avoid hidden copies.
    )(x, pe_slice)

    # TODO(synk): nn.Dropout(p=0.1) is stochastic in training mode; this kernel
    # implements the deterministic eval-mode forward, where dropout is identity.
    return out


if __name__ == "__main__":
    d_model = 32
    batch = 8
    seq_len = 8  # must equal batch for the module's literal broadcast to be valid

    key = jax.random.PRNGKey(0)
    x = jax.random.normal(key, (batch, seq_len, d_model), dtype=jnp.float32)

    pe = make_pe_buffer(d_model, max_len=5000)
    y = jax.block_until_ready(positional_encoding_forward(x, pe))

    # Pure-JAX reference with the same broadcasting as torch.
    ref = x + pe[:seq_len]
    assert y.shape == x.shape and y.dtype == x.dtype
    np.testing.assert_allclose(np.asarray(y), np.asarray(ref), rtol=1e-6, atol=1e-6)
    print("KERNEL_OK")
</pallas_src>

<mosaic_0001>
module attributes {stable_mosaic.version = 11 : i64} {
  func.func @_add_pe_kernel(%arg0: i32, %arg1: memref<4x8x32xf32, #tpu.memory_space<vmem>>, %arg2: memref<4x1x32xf32, #tpu.memory_space<vmem>>, %arg3: memref<4x8x32xf32, #tpu.memory_space<vmem>>) attributes {dimension_semantics = [#tpu.dimension_semantics<parallel>], iteration_bounds = array<i64: 2>, scalar_prefetch = 0 : i64, scratch_operands = 0 : i64, tpu.core_type = #tpu.core_type<tc>, window_params = [{transform_indices = @transform_0, window_bounds = array<i64: 4, 8, 32>}, {transform_indices = @transform_1, window_bounds = array<i64: 4, 1, 32>}, {transform_indices = @transform_2, window_bounds = array<i64: 4, 8, 32>}]} {
    %c0 = arith.constant 0 : index
    %c0_0 = arith.constant 0 : index
    %c0_1 = arith.constant 0 : index
    %0 = vector.load %arg1[%c0, %c0_0, %c0_1] : memref<4x8x32xf32, #tpu.memory_space<vmem>>, vector<4x8x32xf32>
    %c0_2 = arith.constant 0 : index
    %c0_3 = arith.constant 0 : index
    %c0_4 = arith.constant 0 : index
    %1 = vector.load %arg2[%c0_2, %c0_3, %c0_4] : memref<4x1x32xf32, #tpu.memory_space<vmem>>, vector<4x1x32xf32>
    %2 = vector.broadcast %1 : vector<4x1x32xf32> to vector<4x8x32xf32>
    %3 = arith.addf %0, %2 : vector<4x8x32xf32>
    %c0_5 = arith.constant 0 : index
    %c0_6 = arith.constant 0 : index
    %c0_7 = arith.constant 0 : index
    %4 = vector.load %arg3[%c0_5, %c0_6, %c0_7] : memref<4x8x32xf32, #tpu.memory_space<vmem>>, vector<4x8x32xf32>
    tpu.vector_store %arg3[%c0_5, %c0_6, %c0_7], %3 {strides = array<i32>} : memref<4x8x32xf32, #tpu.memory_space<vmem>>, vector<4x8x32xf32>,
    return
  }
  func.func @transform_0(%arg0: i32) -> (i32, i32, i32) {
    %c0_i32 = arith.constant 0 : i32
    %c0_i32_0 = arith.constant 0 : i32
    %c0_i32_1 = arith.constant 0 : i32
    return %arg0, %c0_i32, %c0_i32_0 : i32, i32, i32
  }
  func.func @transform_1(%arg0: i32) -> (i32, i32, i32) {
    %c0_i32 = arith.constant 0 : i32
    %c0_i32_0 = arith.constant 0 : i32
    %c0_i32_1 = arith.constant 0 : i32
    return %arg0, %c0_i32, %c0_i32_0 : i32, i32, i32
  }
  func.func @transform_2(%arg0: i32) -> (i32, i32, i32) {
    %c0_i32 = arith.constant 0 : i32
    %c0_i32_0 = arith.constant 0 : i32
    %c0_i32_1 = arith.constant 0 : i32
    return %arg0, %c0_i32, %c0_i32_0 : i32, i32, i32
  }
}

</mosaic_0001>

<bundles_post_ra>
// kernel: tpu_custom_call.1
= control target key start
LH: loop header
LB: loop body
LE: loop exit
PB: predicated region body
PF: predicated region fallthrough
CT: control target
= control target key end

     0   :  { %7 = vsyncpa [#allocation3], 0  ;;  %s801_s0 = inlined_call_operand.hbm [shape: f32[8,8,32], index: 0, kind: input, shape index: {}]   ;;  %s802_s1 = inlined_call_operand.hbm [shape: f32[8,1,32], index: 1, kind: input, shape index: {}]   ;;  %s803_s2 = inlined_call_operand.hbm [shape: f32[8,8,32], index: 2, kind: output, shape index: {}]  }
   0x1   :  { %9 = vsyncpa [#allocation3 + $0x1], 0 }
   0x2   :  { %10 = vsyncpa [#allocation6], 0 }
   0x3   :  { %12 = vsyncpa [#allocation6 + $0x1], 0 }
   0x4   :  { %13 = vsyncpa [#allocation4], 0 }
   0x5   :  { %15 = vsyncpa [#allocation4 + $0x1], 0  ;;  %s588_s9 = smov 0   ;;  %s590_s10 = smov 0  }
   0x6   :  { %s592_s11 = smov 0   ;;  %s594_s12 = smov 0  }
   0x7 LB: > { %s609_s13 = sadd.s32 4294967295, %s562_s12   ;;  %s356_s14 = sadd.s32 4294967294, %s562_s12   ;;  %s562_s12 = sphi %s594_s12, %s819_s12   ;;  %s558_s11 = sphi %s592_s11, %s818_s11   ;;  %s554_s10 = sphi %s590_s10, %s817_s10   ;;  %s550_s9 = sphi %s588_s9, %s816_s9  }
   0x8   : > { %s613_s15 = sadd.s32 1, %s562_s12   ;;  %s28_s16 = sadd.s32 1, %s558_s11 }
   0x9   : > { %s25_s17 = ssub.s32 %s562_s12, %s613_s15  ;;  %p35_p0 = scmp.ne.s32.totalorder %s558_s11, %s554_s10 }
   0xa   : > { %p26_p1 = scmp.eq.s32.totalorder %s25_s17, 0  ;;  %p36_p2 = scmp.eq.s32.totalorder %s562_s12, 0 }
   0xb   : > { %p41_p3 = scmp.ne.s32.totalorder %s554_s10, %s550_s9  ;;  %p42_p4 = scmp.eq.s32.totalorder %s609_s13, 0 }
   0xc   : > { %s625_s18 = scalar_select %p26_p1, %s558_s11, %s28_s16  }
   0xd   : > { %p627_p5 = por %p36_p2, %p35_p0  ;;  %p631_p6 = por %p42_p4, %p41_p3 }
   0xe   : > { %p91_p7 = scmp.eq.s32.totalorder %s609_s13, 1  ;;  %p97_p8 = scmp.eq.s32.totalorder %s356_s14, 1 }
   0xf   : > { %s807_s20 = scalar_select %p631_p6, 1, 0 }
  0x10   : > { %p398_p10 = scmp.lt.s32.totalorder %s562_s12, 2  ;;  %p638_p11 = por %p91_p7, %p35_p0 }
  0x11   : > { %p642_p12 = por %p97_p8, %p41_p3  ;;  %s647_s23 = sand.u32 1, %s558_s11  }
  0x12   : > { %s808_s21 = scalar_select %p638_p11, 1, 0 }
  0x13   : > { %s809_s22 = scalar_select %p642_p12, 1, 0 }
  0x14   : > { %s378_s24 = sshll.u32 %s562_s12, 9  ;;  %s359_s25 = sshll.u32 %s647_s23, 5 }
  0x15   : > { %s654_s28 = scalar_lea.hbm %s801_s0, %s378_s24  ;;  %s121_s29 = scalar_lea.vmem [#allocation2], %s359_s25 }
  0x16   : > { %s128_s30 = sshll.u32 %s121_s29, 4  ;;  %p658_p13 = pnand %p398_p10, %p627_p5  ;;  %s662_s30 = int_to_ptr.vmem [resolvable:$true] %s128_s30 }
  0x17   : > { %s118_s4 = scalar_lea.sflag [#allocation3], %s647_s23  ;;  %s438_s5 = scalar_lea.hbm %s654_s28, 512 }
  0x18   : > { %p439_p0 = scmp.ne.s32.totalorder %s654_s28, %s438_s5  ;;  %p440_p1 = pneg %p658_p13 }
  0x19   : > { %s443_s8 = scalar_lea.hbm %s801_s0, 1024  ;;  %p444_p4 = scmp.lt.s32.totalorder %s654_s28, %s801_s0 }
  0x1a   : > { %p441_p2 = pnand %p440_p1, %p439_p0  ;;  %p445_p5 = scmp.lt.s32.totalorder %s443_s8, %s438_s5 }
  0x1c   : > { %p442_p3 = pneg %p441_p2  ;;  %p446_p7 = por %p445_p5, %p444_p4 }
  0x1e   : > { %p447_p8 = pnand %p446_p7, %p442_p3 }
  0x20   : > { %450 = shalt.err (!%p447_p8)
}
  0x21   : > { %s451_s17 = scalar_lea.vmem %s662_s30, 512  ;;  %s564_s19 = smov [#allocation2]  }
  0x22   : > { %p452_p10 = scmp.ne.s32.totalorder %s662_s30, %s451_s17  ;;  %s456_s24 = sshll.u32 %s564_s19, 4  ;;  %s457_s24 = int_to_ptr.vmem [resolvable:$false] %s456_s24 }
  0x23   : > { %s458_s25 = scalar_lea.vmem %s457_s24, 1024  ;;  %p459_p9 = scmp.lt.s32.totalorder %s662_s30, %s457_s24 }
  0x24   : > { %p454_p0 = pnand %p452_p10, %p440_p1  ;;  %p460_p12 = scmp.lt.s32.totalorder %s458_s25, %s451_s17 }
  0x26   : > { %p455_p2 = pneg %p454_p0  ;;  %p461_p11 = por %p460_p12, %p459_p9 }
  0x28   : > { %p462_p4 = pnand %p461_p11, %p455_p2 }
  0x2a   : > { %465 = shalt.err (!%p462_p4)
}
  0x2b   : > { %s565_s26 = smov 128   ;;  %s566_s27 = smov 8  }
  0x2c   : > { %390 = dma.hbm_to_vmem [thread:$0]  (!%p658_p13), %s654_s28, 512, %s662_s30, %s118_s4, %s565_s26, %s565_s26, %s566_s27  }
  0x2d   : > { %p365_p3 = scmp.ge.s32.totalorder %s562_s12, 1  ;;  %p157_p5 = scmp.lt.s32.totalorder %s562_s12, 3 }
  0x2e   : > { %s362_s29 = sshll.u32 %s647_s23, 2  ;;  %s379_s6 = sshll.u32 %s562_s12, 6 }
  0x2f   : > { %p694_p9 = pnand %p365_p3, %p157_p5  ;;  %s142_s7 = scalar_lea.vmem [#allocation5], %s362_s29 }
  0x30   : > { %s149_s8 = sshll.u32 %s142_s7, 4  ;;  %s702_s17 = scalar_lea.hbm %s802_s1, %s379_s6  ;;  %s704_s8 = int_to_ptr.vmem [resolvable:$true] %s149_s8 }
  0x31   : > { %s139_s28 = scalar_lea.sflag [#allocation6], %s647_s23  ;;  %s466_s30 = scalar_lea.hbm %s702_s17, 64 }
  0x32   : > { %p467_p11 = scmp.ne.s32.totalorder %s702_s17, %s466_s30  ;;  %s471_s24 = scalar_lea.hbm %s802_s1, 128 }
  0x33   : > { %p472_p8 = scmp.lt.s32.totalorder %s702_s17, %s802_s1  ;;  %p473_p10 = scmp.lt.s32.totalorder %s471_s24, %s466_s30 }
  0x34   : > { %p469_p12 = pnand %p467_p11, %p440_p1 }
  0x35   : > { %p474_p0 = por %p473_p10, %p472_p8 }
  0x36   : > { %p470_p7 = pneg %p469_p12 }
  0x38   : > { %p475_p2 = pnand %p474_p0, %p470_p7 }
  0x3a   : > { %478 = shalt.err (!%p475_p2)
}
  0x3b   : > { %s479_s27 = scalar_lea.vmem %s704_s8, 64  ;;  %s567_s29 = smov [#allocation5]  }
  0x3c   : > { %p480_p4 = scmp.ne.s32.totalorder %s704_s8, %s479_s27  ;;  %s484_s6 = sshll.u32 %s567_s29, 4  ;;  %s485_s6 = int_to_ptr.vmem [resolvable:$false] %s484_s6 }
  0x3d   : > { %s486_s7 = scalar_lea.vmem %s485_s6, 128  ;;  %p487_p11 = scmp.lt.s32.totalorder %s704_s8, %s485_s6 }
  0x3e   : > { %p482_p3 = pnand %p480_p4, %p440_p1  ;;  %p488_p12 = scmp.lt.s32.totalorder %s486_s7, %s479_s27 }
  0x40   : > { %p483_p5 = pneg %p482_p3  ;;  %p489_p6 = por %p488_p12, %p487_p11 }
  0x42   : > { %p490_p8 = pnand %p489_p6, %p483_p5 }
  0x44   : > { %493 = shalt.err (!%p490_p8)
}
  0x45   : > { %s568_s14 = smov 16   ;;  %s569_s16 = smov 1  }
  0x46   : > { %393 = dma.hbm_to_vmem [thread:$0]  (!%p658_p13), %s702_s17, 64, %s704_s8, %s139_s28, %s568_s14, %s568_s14, %s569_s16  }
  0x47   : > { %161 = sbr.rel (%p694_p9) target bundleno = 106 (0x6a), region = 28  ;;  %s734_s30 = sand.u32 (!%p694_p9), 1, %s554_s10  }
  0x48   : > { %s366_s4 = sshll.u32 (!%p694_p9), %s734_s30, 5  ;;  %s164_s19 = scalar_lea.sflag (!%p694_p9), [#allocation3], %s734_s30 }
  0x49   : > { %s167_s24 = scalar_lea.vmem (!%p694_p9), [#allocation2], %s366_s4  ;;  %p812_p6 = scmp.ne.s32.totalorder (!%p694_p9), %s807_s20, 0 }
  0x4c   : > { %537 = dma.done.wait (%p812_p6), %s164_s19, 512  }
  0x4d   : > { %539 = vsyncadd (%p812_p6), %s164_s19, 4294966784  ;;  %s367_s23 = sshll.u32 %s734_s30, 2  ;;  %s173_s3 = scalar_lea.sflag [#allocation6], %s734_s30 }
  0x4e   : > { %s176_s5 = scalar_lea.vmem [#allocation5], %s367_s23 }
  0x4f   : > { %541 = dma.done.wait (%p812_p6), %s173_s3, 64  }
  0x50   : > { %543 = vsyncadd (%p812_p6), %s173_s3, 4294967232  ;;  %s201_s8 = scalar_lea.vmem [#allocation7], %s366_s4  ;;  %s380_s28 = sshll.u32 %s609_s13, 9  ;;  %v205_v0 = vld [vmem:[%s167_s24] sm:$0xff]  ;;  %vm241_vm0 = vcmask 261120   ;;  %v206_v2 = vld [vmem:[%s167_s24 + $0x8] sm:$0xff] }
  0x51   : > { %s260_s17 = sshll.u32 %s201_s8, 4  ;;  %v369_v1 = vld [vmem:[%s176_s5] ss:$0 sm:$0xff]  ;;  %v370_v4 = vld [vmem:[%s176_s5 + $0x1] ss:$0 sm:$0xff]  ;;  %v207_v5 = vld [vmem:[%s167_s24 + $0x10] sm:$0xff]  ;;  %s754_s25 = scalar_lea.hbm %s803_s2, %s380_s28  ;;  %s749_s17 = int_to_ptr.vmem [resolvable:$true] %s260_s17 }
  0x52   : > { %v237_v3 = vadd.f32 %v369_v1, %v205_v0  ;;  %v371_v6 = vld [vmem:[%s176_s5 + $0x2] ss:$0 sm:$0xff]  ;;  %v238_v7 = vadd.f32 %v370_v4, %v206_v2  ;;  %v208_v9 = vld [vmem:[%s167_s24 + $0x18] sm:$0xff]  ;;  %v372_v10 = vld [vmem:[%s176_s5 + $0x3] ss:$0 sm:$0xff]  ;;  %s247_s26 = scalar_lea.sflag [#allocation4], %s734_s30 }
  0x53   : > { %v239_v8 = vadd.f32 %v371_v6, %v207_v5  ;;  %v240_v11 = vadd.f32 %v372_v10, %v208_v9  ;;  %s494_s27 = scalar_lea.vmem %s749_s17, 512  ;;  %p813_p1 = scmp.ne.s32.totalorder %s808_s21, 0 }
  0x54   : > { %242 = vst.msk [vmem:[%s201_s8] sm:$0xff] %vm241_vm0, %v237_v3  ;;  %243 = vst.msk [vmem:[%s201_s8 + $0x8] sm:$0xff] %vm241_vm0, %v238_v7  ;;  %p495_p13 = scmp.ne.s32.totalorder %s749_s17, %s494_s27  ;;  %s570_s29 = smov [#allocation7]  }
  0x55   : > { %244 = vst.msk [vmem:[%s201_s8 + $0x10] sm:$0xff] %vm241_vm0, %v239_v8  ;;  %245 = vst.msk [vmem:[%s201_s8 + $0x18] sm:$0xff] %vm241_vm0, %v240_v11  ;;  %s498_s6 = sshll.u32 %s570_s29, 4  ;;  %s499_s6 = int_to_ptr.vmem [resolvable:$false] %s498_s6 }
  0x56   : > { %p496_p9 = pnand %p495_p13, %p813_p1  ;;  %s500_s7 = scalar_lea.vmem %s499_s6, 1024 }
  0x57   : > { %p501_p10 = scmp.lt.s32.totalorder %s749_s17, %s499_s6  ;;  %p502_p0 = scmp.lt.s32.totalorder %s500_s7, %s494_s27 }
  0x58   : > { %p497_p7 = pneg %p496_p9 }
  0x59   : > { %p503_p2 = por %p502_p0, %p501_p10 }
  0x5b   : > { %p504_p4 = pnand %p503_p2, %p497_p7 }
  0x5d   : > { %507 = shalt.err (!%p504_p4)
}
  0x5e   : > { %s508_s14 = scalar_lea.hbm %s754_s25, 512  ;;  %s512_s19 = scalar_lea.hbm %s803_s2, 1024 }
  0x5f   : > { %p509_p3 = scmp.ne.s32.totalorder %s754_s25, %s508_s14  ;;  %p513_p12 = scmp.lt.s32.totalorder %s754_s25, %s803_s2 }
  0x60   : > { %p514_p8 = scmp.lt.s32.totalorder %s512_s19, %s508_s14 }
  0x61   : > { %p510_p5 = pnand %p509_p3, %p813_p1 }
  0x62   : > { %p515_p6 = por %p514_p8, %p513_p12 }
  0x63   : > { %p511_p11 = pneg %p510_p5 }
  0x65   : > { %p516_p13 = pnand %p515_p6, %p511_p11 }
  0x67   : > { %519 = shalt.err (!%p516_p13)
}
  0x68   : > { %s571_s3 = smov 128   ;;  %s572_s5 = smov 8  }
  0x69   : > { %385 = dma.vmem_to_hbm [thread:$0]  (%p813_p1), %s749_s17, 512, %s754_s25, %s247_s26, %s571_s3, %s571_s3, %s572_s5  }
  0x6a PF: > { %s275_s8 = sand.u32 1, %s550_s9   ;;  %p814_p9 = scmp.ne.s32.totalorder %s809_s22, 0 }
  0x6b   : > { %p815_p7 = scmp.ge.s32.totalorder %s562_s12, 2  ;;  %s276_s28 = scalar_lea.sflag [#allocation4], %s275_s8 }
  0x6d   : > { %p395_p10 = pnand %p815_p7, %p814_p9 }
  0x6f   : > { %p396_p0 = pneg %p395_p10 }
  0x71   : > { %545 = dma.done.wait (%p396_p0), %s276_s28, 512  }
  0x72   : > { %547 = vsyncadd (%p396_p0), %s276_s28, 4294966784  ;;  %p18_p2 = scmp.ge.s32.totalorder %s613_s15, 4   ;;  %s816_s9 = smov %s554_s10 }
  0x73   : > { %s817_s10 = smov %s558_s11  ;;  %s818_s11 = smov %s625_s18 }
  0x74   : > { %s819_s12 = smov %s613_s15  ;;  %20 = sbr.rel (!%p18_p2) target bundleno = 7 (0x7), region = 86 }
  0x79   :  { %281 = vsyncpa [#allocation3], 1 }
  0x7a   :  { %283 = vsyncpa [#allocation3 + $0x1], 1 }
  0x7b   :  { %284 = vsyncpa [#allocation6], 1 }
  0x7c   :  { %286 = vsyncpa [#allocation6 + $0x1], 1 }
  0x7d   :  { %287 = vsyncpa [#allocation4], 1 }
  0x7e   :  { %289 = vsyncpa [#allocation4 + $0x1], 1 }

</bundles_post_ra>
